<compile_context>
chip_gen: v7x
topology: tpu7x:2x2x1
jax: 0.10.0
libtpu: 0.0.40
codegen_flags: <defaults>
</compile_context>

<pallas_src>
from enum import IntEnum
from typing import Any, Dict, Optional, Set

import jax
import jax.numpy as jnp
from jax.experimental import pallas as pl
from jax.experimental.pallas import tpu as pltpu


# ----------------------------------------------------------------------------
# RunMode / DataFormat — identical semantics to the PyTorch reference
# ----------------------------------------------------------------------------
class RunMode(IntEnum):
    TRAIN = 0
    VALIDATE = 1
    INFER = 2


class DataFormat(object):
    def __init__(self, required_elements: Set[str]) -> None:
        self.required_elements = required_elements

    def satisfied_by(self, data_dict: Dict[str, Any]) -> bool:
        return all((x in data_dict for x in self.required_elements))

    def __iter__(self):
        for x in self.required_elements:
            yield x

    def for_run_mode(self, run_mode: RunMode):
        elements = []
        for k in self.required_elements:
            ksplit = k.split(":")
            if len(ksplit) == 1:
                elements.append(k)
            elif len(ksplit) == 2:
                if ksplit[1].upper() == run_mode.name:
                    elements.append(ksplit[0])
        return DataFormat(elements)


# ----------------------------------------------------------------------------
# Pallas kernel: lane-dense identity pass-through.
# ----------------------------------------------------------------------------
_LANE = 128
_SUBLANE = 8
# ~2 MiB per block: with double-buffered input + output that is <= 8 MiB
# resident, well inside v7x's 64 MiB VMEM (and trivially inside v5e/v6e's
# 128 MiB).  Large enough to reach ~85%+ of HBM copy roofline.
_TARGET_BLOCK_BYTES = 2 * 1024 * 1024


def _identity_copy_kernel(x_ref, o_ref):
    o_ref[...] = x_ref[...]


def _choose_lane_width(n: int) -> int:
    """Widest lane-dense (multiple-of-128) last dim that divides n."""
    for c in (2048, 1024, 512, 256, _LANE):
        if n % c == 0:
            return c
    # Ragged size: use the whole flat array as a single block
    # (block dims == full array dims satisfies the (8,128) rule).
    return n


def pallas_passthrough(x: jax.Array) -> jax.Array:
    """Identity copy through VMEM over a lane-dense 2D view of `x`."""
    x = jnp.asarray(x)
    n = int(x.size)
    if n == 0:
        return x

    orig_shape = x.shape
    dtype = x.dtype

    lane = _choose_lane_width(n)
    rows = n // lane
    x2 = x.reshape(rows, lane)

    bytes_per_row = lane * dtype.itemsize
    target_rows = max(_SUBLANE, _TARGET_BLOCK_BYTES // bytes_per_row)
    target_rows -= target_rows % _SUBLANE          # multiple of 8 sublanes
    # Either the full row extent (always legal) or a multiple-of-8 tile.
    block_rows = rows if rows <= target_rows else target_rows
    grid = (pl.cdiv(rows, block_rows),)

    out = pl.pallas_call(
        _identity_copy_kernel,
        out_shape=jax.ShapeDtypeStruct((rows, lane), dtype),
        grid_spec=pltpu.PrefetchScalarGridSpec(
            num_scalar_prefetch=0,
            grid=grid,
            in_specs=[pl.BlockSpec((block_rows, lane), lambda r: (r, 0))],
            out_specs=pl.BlockSpec((block_rows, lane), lambda r: (r, 0)),
        ),
        compiler_params=pltpu.CompilerParams(
            # parallel row axis -> shards across the 2 TensorCores on v7x;
            # neutral on single-TC v5e/v6e.
            dimension_semantics=("parallel",),
            vmem_limit_bytes=32 * 1024 * 1024,
        ),
        # Output aliases the input: no second HBM buffer / writeback stream
        # is required when the input is dead after this call (e.g. inside a
        # larger jit with donation).
        input_output_aliases={0: 0},
    )(x2)
    return out.reshape(orig_shape)


# ----------------------------------------------------------------------------
# JAX/Pallas analogue of the abstract Module
# ----------------------------------------------------------------------------
class ModulePallas:
    """Pallas-backed analogue of diffstack Module (abstract base).

    A minimal concrete input/output format is declared so the dict plumbing
    (apply_input_mappings) can be exercised.  The tensor path is either the
    zero-copy pass-through (optimal: the base class defines no compute) or the
    lane-dense Pallas identity kernel above.
    """

    @property
    def name(self) -> str:
        # NOTE: the PyTorch reference forgets the `return`; the obvious intent
        # is returned here.
        return self.__class__.__name__

    @property
    def input_format(self) -> DataFormat:
        return DataFormat({"x", "label:train"})

    @property
    def output_format(self) -> DataFormat:
        return DataFormat({"x", "label:train"})

    def __init__(
        self,
        model_registrar: Any,
        hyperparams: Dict[str, Any],
        log_writer: Optional[Any],
        device: str,
        input_mappings: Dict[str, str] = {},
        use_pallas_passthrough: bool = True,
    ) -> None:
        self.model_registrar = model_registrar
        self.hyperparams = hyperparams
        self.log_writer = log_writer
        self.device = device
        self.input_mappings = input_mappings
        self.curr_iter = 0
        self.curr_epoch = 0
        # True  -> route every mapped tensor through the Pallas identity kernel.
        # False -> zero-copy: return the mapped arrays as-is (fastest possible
        #          realization of the abstract base's pass-through semantics).
        self.use_pallas_passthrough = use_pallas_passthrough

    def apply_input_mappings(
        self, inputs: Dict, run_mode: RunMode, allow_partial: bool = False
    ):
        mapped_inputs = {}
        for k in self.input_format.for_run_mode(run_mode):
            if k in self.input_mappings:
                if self.input_mappings[k] in inputs:
                    mapped_inputs[k] = inputs[self.input_mappings[k]]
                elif not allow_partial:
                    raise ValueError(
                        f"Key `{k}` is remapped `{k}`<--`{self.input_mappings[k]}` but "
                        f"there is no key `{self.input_mappings[k]}` in inputs.\n  "
                        f"inputs={list(inputs.keys())};\n  "
                        f"input_mappings={self.input_mappings}"
                    )
            elif k in inputs:
                mapped_inputs[k] = inputs[k]
            elif not allow_partial:
                raise ValueError(
                    f"Key `{k}` is not found in inputs and input_mappings.\n  "
                    f"inputs={list(inputs.keys())};\n  "
                    f"input_mappings={self.input_mappings}"
                )
        return mapped_inputs

    def set_curr_iter(self, curr_iter):
        self.curr_iter = curr_iter

    def set_curr_epoch(self, curr_epoch):
        self.curr_epoch = curr_epoch

    def set_annealing_params(self):
        pass

    def step_annealers(self, node_type=None):
        pass

    # forward -> train -> _run_forward(TRAIN), mirroring the reference
    def forward(self, inputs: Dict) -> Dict:
        return self.train(inputs)

    def train(self, inputs: Dict) -> Dict:
        return self._run_forward(inputs, RunMode.TRAIN)

    def validate(self, inputs: Dict) -> Dict:
        return self._run_forward(inputs, RunMode.VALIDATE)

    def infer(self, inputs: Dict) -> Dict:
        return self._run_forward(inputs, RunMode.INFER)

    def _run_forward(self, inputs: Dict, run_mode: RunMode) -> Dict:
        # The base class is abstract; the only defined semantics are the input
        # mapping + pass-through of tensors.
        mapped = self.apply_input_mappings(inputs, run_mode)
        if not self.use_pallas_passthrough:
            # Zero-copy identity: no HBM traffic, no kernel launches.
            return {k: jnp.asarray(v) for k, v in mapped.items()}
        # One Pallas call per key.  Batching heterogeneous dtypes/shapes into a
        # single call would require concat/split copies that cost as much as the
        # pass-through itself; the zero-copy path above is the launch-free option.
        return {k: pallas_passthrough(jnp.asarray(v)) for k, v in mapped.items()}


# ----------------------------------------------------------------------------
# main
# ----------------------------------------------------------------------------
if __name__ == "__main__":
    key = jax.random.PRNGKey(0)
    kx, kl = jax.random.split(key)

    # Small NCHW input + a train-only label, per the input_format convention.
    x = jax.random.normal(kx, (2, 4, 16, 16), dtype=jnp.float32)   # 2048 elems -> lane-dense
    label = jax.random.normal(kl, (2, 8), dtype=jnp.float32)       # ragged (16 elems)

    module = ModulePallas(
        model_registrar=None,
        hyperparams={},
        log_writer=None,
        device="tpu",
        input_mappings={"x": "rgb_image"},  # exercise input remapping
        use_pallas_passthrough=True,
    )

    inputs = {"rgb_image": x, "label": label}

    # TRAIN run mode: requires both "x" (remapped from "rgb_image") and "label".
    out_train = module.forward(inputs)
    jax.block_until_ready(out_train["x"])
    jax.block_until_ready(out_train["label"])
    assert out_train["x"].shape == x.shape and out_train["x"].dtype == x.dtype
    assert bool(jnp.all(out_train["x"] == x))
    assert out_train["label"].shape == label.shape
    assert bool(jnp.all(out_train["label"] == label))

    # INFER run mode: label is not required / not produced.
    out_infer = module.infer({"rgb_image": x})
    jax.block_until_ready(out_infer["x"])
    assert "label" not in out_infer
    assert bool(jnp.all(out_infer["x"] == x))

    # Zero-copy variant (optimal path per the identity semantics).
    zc_module = ModulePallas(
        model_registrar=None,
        hyperparams={},
        log_writer=None,
        device="tpu",
        input_mappings={"x": "rgb_image"},
        use_pallas_passthrough=False,
    )
    out_zc = zc_module.forward(inputs)
    jax.block_until_ready(out_zc["x"])
    assert bool(jnp.all(out_zc["x"] == x))
    assert bool(jnp.all(out_zc["label"] == label))

    print("KERNEL_OK")
</pallas_src>

<mosaic_0001>
module attributes {stable_mosaic.version = 11 : i64} {
  func.func @_identity_copy_kernel(%arg0: i32, %arg1: memref<1x16xf32, #tpu.memory_space<vmem>>, %arg2: memref<1x16xf32, #tpu.memory_space<vmem>>) attributes {dimension_semantics = [#tpu.dimension_semantics<parallel>], iteration_bounds = array<i64: 1>, scalar_prefetch = 0 : i64, scratch_operands = 0 : i64, tpu.core_type = #tpu.core_type<tc>, window_params = [{transform_indices = @transform_0, window_bounds = array<i64: 1, 16>}, {transform_indices = @transform_1, window_bounds = array<i64: 1, 16>}]} {
    %c0 = arith.constant 0 : index
    %c0_0 = arith.constant 0 : index
    %0 = vector.load %arg1[%c0, %c0_0] : memref<1x16xf32, #tpu.memory_space<vmem>>, vector<1x16xf32>
    %c0_1 = arith.constant 0 : index
    %c0_2 = arith.constant 0 : index
    %1 = vector.load %arg2[%c0_1, %c0_2] : memref<1x16xf32, #tpu.memory_space<vmem>>, vector<1x16xf32>
    tpu.vector_store %arg2[%c0_1, %c0_2], %0 {strides = array<i32>} : memref<1x16xf32, #tpu.memory_space<vmem>>, vector<1x16xf32>,
    return
  }
  func.func @transform_0(%arg0: i32) -> (i32, i32) {
    %c0_i32 = arith.constant 0 : i32
    %c0_i32_0 = arith.constant 0 : i32
    return %arg0, %c0_i32 : i32, i32
  }
  func.func @transform_1(%arg0: i32) -> (i32, i32) {
    %c0_i32 = arith.constant 0 : i32
    %c0_i32_0 = arith.constant 0 : i32
    return %arg0, %c0_i32 : i32, i32
  }
}

</mosaic_0001>

<bundles_post_ra>
// kernel: tpu_custom_call.1
= control target key start
LH: loop header
LB: loop body
LE: loop exit
PB: predicated region body
PF: predicated region fallthrough
CT: control target
= control target key end

     0   :  { %6 = vsyncpa [#allocation3], 0  ;;  %s125_s0 = inlined_call_operand.hbm [shape: f32[1,16], index: 0, kind: input, shape index: {}, may-alias: {0,1}]   ;;  %s126_s1 = inlined_call_operand.hbm [shape: f32[1,16], index: 1, kind: output, shape index: {}, may-alias: {0,1}]  }
   0x1   :  { %7 = vsyncpa [#allocation4], 0  ;;  %s89_s6 = smov [#allocation2]   ;;  %s41_s10 = scalar_lea.hbm %s125_s0, 16 }
   0x2   :  { %s14_s7 = sshll.u32 %s89_s6, 4  ;;  %p42_p0 = scmp.ne.s32.totalorder %s125_s0, %s41_s10  ;;  %s15_s7 = int_to_ptr.vmem [resolvable:$true] %s14_s7 }
   0x3   :  { %p45_p1 = scmp.lt.u32.totalorder %s41_s10, %s125_s0 }
   0x5   :  { %p47_p2 = pnand %p45_p1, %p42_p0 }
   0x7   :  { %50 = shalt.err (!%p47_p2)
}
   0x8   :  { %s51_s15 = scalar_lea.vmem %s15_s7, 16  ;;  %s55_s16 = scalar_lea.vmem %s15_s7, 32 }
   0x9   :  { %p52_p3 = scmp.ne.s32.totalorder %s15_s7, %s51_s15  ;;  %p56_p4 = scmp.lt.s32.totalorder %s15_s7, %s15_s7 }
   0xa   :  { %p57_p5 = scmp.lt.s32.totalorder %s55_s16, %s51_s15 }
   0xc   :  { %p58_p6 = por %p57_p5, %p56_p4 }
   0xe   :  { %p59_p7 = pnand %p58_p6, %p52_p3 }
  0x10   :  { %62 = shalt.err (!%p59_p7)
}
  0x11   :  { %17 = dma.hbm_to_vmem [thread:$0]  %s125_s0, 16, %s15_s7, [#allocation3]  }
  0x12   :  { %85 = dma.done.wait [#allocation3], 16  }
  0x13   :  { %86 = vsyncadd [#allocation3], 4294967280  ;;  %s90_s19 = smov [#allocation5]   ;;  %vm22_vm0 = vcmask 122880   ;;  %v21_v0 = vld [vmem:[#allocation2] sm:$0x1] }
  0x14   :  { %s30_s20 = sshll.u32 %s90_s19, 4  ;;  %23 = vst.msk [vmem:[#allocation5] sm:$0x1] %vm22_vm0, %v21_v0  ;;  %s31_s20 = int_to_ptr.vmem [resolvable:$true] %s30_s20 }
  0x15   :  { %s63_s21 = scalar_lea.vmem %s31_s20, 16  ;;  %s67_s22 = scalar_lea.vmem %s31_s20, 32 }
  0x16   :  { %p64_p8 = scmp.ne.s32.totalorder %s31_s20, %s63_s21  ;;  %p68_p9 = scmp.lt.s32.totalorder %s31_s20, %s31_s20 }
  0x17   :  { %p69_p10 = scmp.lt.s32.totalorder %s67_s22, %s63_s21 }
  0x19   :  { %p70_p11 = por %p69_p10, %p68_p9 }
  0x1b   :  { %p71_p12 = pnand %p70_p11, %p64_p8 }
  0x1d   :  { %74 = shalt.err (!%p71_p12)
}
  0x1e   :  { %s75_s0 = scalar_lea.hbm %s126_s1, 16 }
  0x1f   :  { %p76_p13 = scmp.ne.s32.totalorder %s126_s1, %s75_s0  ;;  %p79_p0 = scmp.lt.u32.totalorder %s75_s0, %s126_s1 }
  0x21   :  { %p81_p1 = pnand %p79_p0, %p76_p13 }
  0x23   :  { %84 = shalt.err (!%p81_p1)
}
  0x24   :  { %33 = dma.vmem_to_hbm [thread:$0]  %s31_s20, 16, %s126_s1, [#allocation4]  }
  0x25   :  { %87 = dma.done.wait [#allocation4], 16  }
  0x26   :  { %88 = vsyncadd [#allocation4], 4294967280 }
  0x27   :  { %37 = vsyncpa [#allocation3], 1 }
  0x28   :  { %38 = vsyncpa [#allocation4], 1 }

</bundles_post_ra>
